<compile_context>
chip_gen: v7x
topology: tpu7x:2x2x1
jax: 0.10.0
libtpu: 0.0.40
codegen_flags: <defaults>
</compile_context>

<pallas_src>
import functools

import jax
import jax.numpy as jnp
from jax.experimental import pallas as pl
from jax.experimental.pallas import tpu as pltpu


_VMEM_LIMIT = 48 * 1024 * 1024   # > 32 MiB default, < 64 MiB v7x physical
_CIN_ALIGN = 32                  # pad Cin+1 so 4*(Cin+1) is a multiple of 128


def _round_up(x, m):
    return ((x + m - 1) // m) * m


def _cparams(sem):
    return pltpu.CompilerParams(dimension_semantics=sem,
                                vmem_limit_bytes=_VMEM_LIMIT)


# ----------------------------------------------------------------------------
# Kernels
# ----------------------------------------------------------------------------
def _proj_kernel(x_ref, w_ref, b_ref, o_ref):
    # x tile is f32 in HBM; cast to bf16 on-chip (cheap VPU work hidden under the
    # matmul), accumulate f32 on the MXU, store bf16 (lane-dense, half traffic).
    x = x_ref[...].astype(jnp.bfloat16)
    y = jnp.dot(x, w_ref[...], preferred_element_type=jnp.float32) + b_ref[...]
    o_ref[...] = y.astype(o_ref.dtype)


def _proj_resize_kernel(x_ref, wp_ref, bp_ref, w2_ref, b2_ref, o_ref):
    # Fused: y = x @ Wp + bp (kept on-chip), z = y @ W2 + b2 (bf16 lane-dense store).
    x = x_ref[...].astype(jnp.bfloat16)
    y = jnp.dot(x, wp_ref[...], preferred_element_type=jnp.float32) + bp_ref[...]
    z = jnp.dot(y.astype(jnp.bfloat16), w2_ref[...],
                preferred_element_type=jnp.float32) + b2_ref[...]
    o_ref[...] = z.astype(o_ref.dtype)


def _folded_conv_kernel(x_ref, w_ref, b_ref, o_ref, *, wp_blocks, tm_rows):
    # 3x3 / stride-2 / pad-1 conv with the 1x1 projection folded into the
    # weights, expressed as a 2x2 stride-1 conv over a space-to-depth block grid:
    #   out[f] = sum_{s in 4 shifts} xblk[f + off(s)] @ M_s  (+ conv bias)
    # off(s) = (s//2)*Wp + (s%2) is a constant row offset in the flattened grid.
    # All 4 shift matmuls run inside one invocation so the folded weight block
    # stays resident across the whole (B, row-tile) grid.
    m = pl.program_id(2)
    row0 = pl.multiple_of(m * tm_rows, 8)
    acc = jnp.zeros((tm_rows, o_ref.shape[-1]), jnp.float32)
    for s in range(4):
        off = (s // 2) * wp_blocks + (s % 2)
        xs = x_ref[0, pl.ds(row0 + off, tm_rows), :]        # (tm_rows, K4) bf16
        acc = acc + jnp.dot(xs, w_ref[s], preferred_element_type=jnp.float32)
    o_ref[0] = (acc + b_ref[...]).astype(o_ref.dtype)


# ----------------------------------------------------------------------------
# pallas_call wrappers
# ----------------------------------------------------------------------------
def proj_1x1(x2d, wp, bp, *, tm=512):
    """(M, K) f32 @ (K, C) bf16 + (1, C) f32 -> (M, C) bf16, tiled over M."""
    M, K = x2d.shape
    _, C = wp.shape
    tm = min(tm, M)
    flops = 2 * M * K * C
    bytes_acc = M * K * 4 + K * C * 2 + C * 4 + M * C * 2
    return pl.pallas_call(
        _proj_kernel,
        out_shape=jax.ShapeDtypeStruct((M, C), jnp.bfloat16),
        grid=(pl.cdiv(M, tm),),
        in_specs=[
            pl.BlockSpec((tm, K), lambda i: (i, 0)),
            pl.BlockSpec((K, C), lambda i: (0, 0)),
            pl.BlockSpec((1, C), lambda i: (0, 0)),
        ],
        out_specs=pl.BlockSpec((tm, C), lambda i: (i, 0)),
        compiler_params=_cparams(("parallel",)),
        cost_estimate=pl.CostEstimate(
            flops=flops, transcendentals=0, bytes_accessed=bytes_acc),
    )(x2d, wp, bp)


def fused_proj_resize(x2d, wp, bp, w2, b2, *, tm=512):
    """Fused 1x1 projection + ConvTranspose(k==stride) as two chained matmuls.

    (M, K) f32 -> y (M, C) on-chip -> z (M, C*k*k) bf16 written lane-dense.
    TODO(synk): at production N=Co*k*k=4096 add an N tile axis (keep y resident)
    to cut per-step VMEM on v7x.
    """
    M, K = x2d.shape
    _, C = wp.shape
    _, N = w2.shape
    tm = min(tm, M)
    flops = 2 * M * K * C + 2 * M * C * N
    bytes_acc = M * K * 4 + (K * C + C * N) * 2 + (C + N) * 4 + M * N * 2
    return pl.pallas_call(
        _proj_resize_kernel,
        out_shape=jax.ShapeDtypeStruct((M, N), jnp.bfloat16),
        grid=(pl.cdiv(M, tm),),
        in_specs=[
            pl.BlockSpec((tm, K), lambda i: (i, 0)),
            pl.BlockSpec((K, C), lambda i: (0, 0)),
            pl.BlockSpec((1, C), lambda i: (0, 0)),
            pl.BlockSpec((C, N), lambda i: (0, 0)),
            pl.BlockSpec((1, N), lambda i: (0, 0)),
        ],
        out_specs=pl.BlockSpec((tm, N), lambda i: (i, 0)),
        compiler_params=_cparams(("parallel",)),
        cost_estimate=pl.CostEstimate(
            flops=flops, transcendentals=0, bytes_accessed=bytes_acc),
    )(x2d, wp, bp, w2, b2)


def folded_conv3x3s2(xblk, w3m, b3, *, wp_blocks, tm_rows, m_pad, tc_cap=512):
    """Projection-folded 3x3/stride-2/pad-1 conv over a space-to-depth block grid.

    Grid = (Cout tiles, B, row tiles), all parallel; the 4 shift matmuls run
    inside the kernel so the folded weights are grid-resident per Cout tile.
    """
    B, rows_p, K4 = xblk.shape
    S, K4w, C = w3m.shape
    assert S == 4 and K4w == K4, (w3m.shape, xblk.shape)
    assert m_pad % tm_rows == 0
    assert m_pad + wp_blocks + 1 <= rows_p          # shifted reads stay in-bounds
    tc = min(tc_cap, C)
    assert C % tc == 0, (C, tc)
    ct, mt = C // tc, m_pad // tm_rows
    # Only 9 of 16 folded sub-blocks are non-zero -> count useful flops only.
    flops = 2 * B * m_pad * 9 * (K4 // 4) * C
    bytes_acc = B * rows_p * K4 * 2 + S * K4 * C * 2 + C * 4 + B * m_pad * C * 2
    kernel = functools.partial(_folded_conv_kernel,
                               wp_blocks=wp_blocks, tm_rows=tm_rows)
    return pl.pallas_call(
        kernel,
        out_shape=jax.ShapeDtypeStruct((B, m_pad, C), jnp.bfloat16),
        grid=(ct, B, mt),
        in_specs=[
            pl.BlockSpec((1, rows_p, K4), lambda c, b, m: (b, 0, 0)),
            pl.BlockSpec((S, K4, tc), lambda c, b, m: (0, 0, c)),
            pl.BlockSpec((1, tc), lambda c, b, m: (0, c)),
        ],
        out_specs=pl.BlockSpec((1, tm_rows, tc), lambda c, b, m: (b, m, c)),
        compiler_params=_cparams(("parallel", "parallel", "parallel")),
        cost_estimate=pl.CostEstimate(
            flops=flops, transcendentals=0, bytes_accessed=bytes_acc),
    )(xblk, w3m, b3)


# ----------------------------------------------------------------------------
# Parameter init (PyTorch layouts) + one-time kernel-ready preparation.
# ----------------------------------------------------------------------------
def init_params(key, in_channels, out_channels):
    scale = 0.02
    ks = jax.random.split(key, 14)
    proj = []
    for i, co in enumerate(out_channels):
        w = scale * jax.random.normal(ks[i], (co, in_channels, 1, 1), jnp.float32)
        b = scale * jax.random.normal(ks[4 + i], (co,), jnp.float32)
        proj.append((w, b))
    resize = [
        # ConvTranspose2d(co0, co0, 4, stride=4): weight (Cin, Cout, 4, 4)
        (scale * jax.random.normal(ks[8], (out_channels[0], out_channels[0], 4, 4), jnp.float32),
         scale * jax.random.normal(ks[9], (out_channels[0],), jnp.float32)),
        # ConvTranspose2d(co1, co1, 2, stride=2): weight (Cin, Cout, 2, 2)
        (scale * jax.random.normal(ks[10], (out_channels[1], out_channels[1], 2, 2), jnp.float32),
         scale * jax.random.normal(ks[11], (out_channels[1],), jnp.float32)),
        None,  # Identity
        # Conv2d(co3, co3, 3, stride=2, padding=1): weight (Cout, Cin, 3, 3)
        (scale * jax.random.normal(ks[12], (out_channels[3], out_channels[3], 3, 3), jnp.float32),
         scale * jax.random.normal(ks[13], (out_channels[3],), jnp.float32)),
    ]
    return proj, resize


def prepare_params(proj, resize):
    """Hoist ALL weight massaging out of the forward path (done once)."""
    hi = jax.lax.Precision.HIGHEST
    kp = {}

    # Layers 0, 1: projection + ConvTranspose(k==stride) as two chained matmuls.
    for i in (0, 1):
        wpt, bp = proj[i]
        co, cin = wpt.shape[0], wpt.shape[1]
        wt, bt = resize[i]
        k = wt.shape[-1]
        kp[f"wp{i}"] = wpt.reshape(co, cin).T.astype(jnp.bfloat16)        # (Cin, Co)
        kp[f"bp{i}"] = bp.reshape(1, co).astype(jnp.float32)
        kp[f"w2{i}"] = wt.reshape(co, co * k * k).astype(jnp.bfloat16)    # (Co, Co*k*k)
        kp[f"b2{i}"] = (jnp.broadcast_to(bt[:, None], (co, k * k))
                        .reshape(1, co * k * k).astype(jnp.float32))
        kp[f"k{i}"] = k

    # Layer 2: projection only.
    wpt, bp = proj[2]
    co, cin = wpt.shape[0], wpt.shape[1]
    kp["wp2"] = wpt.reshape(co, cin).T.astype(jnp.bfloat16)
    kp["bp2"] = bp.reshape(1, co).astype(jnp.float32)

    # Layer 3: fold the 1x1 projection (incl. its bias, via a ones-channel) into
    # the 3x3/stride-2 conv, reorganized for the 2x2 space-to-depth formulation.
    # Cin+1 is zero-padded to a multiple of _CIN_ALIGN so K4 is lane-aligned.
    wpt, bp = proj[3]
    co, cin = wpt.shape[0], wpt.shape[1]
    w3, b3 = resize[3]                                  # (Cout, Cmid, 3, 3), (Cout,)
    cout = w3.shape[0]
    cin1 = cin + 1
    cin1p = _round_up(cin1, _CIN_ALIGN)
    wp_aug = jnp.concatenate([wpt.reshape(co, cin), bp[:, None]], axis=1)  # (Cmid, Cin+1)
    # wfold[kh, kw, ci, co] = sum_c w3[co, c, kh, kw] * wp_aug[c, ci]
    wfold = jnp.einsum('ochw,ci->hwio', w3, wp_aug, precision=hi)          # (3,3,Cin1,Cout)
    wfold = jnp.pad(wfold, ((0, 0), (0, 0), (0, cin1p - cin1), (0, 0)))    # (3,3,Cin1p,Cout)
    blocks = []
    for dh in (0, 1):
        for dw in (0, 1):
            rows = []
            for u in (0, 1):
                for v in (0, 1):
                    kh, kw = 2 * dh + u, 2 * dw + v
                    if kh < 3 and kw < 3:
                        rows.append(wfold[kh, kw])
                    else:
                        rows.append(jnp.zeros((cin1p, cout), jnp.float32))
            blocks.append(jnp.concatenate(rows, axis=0))                   # (4*Cin1p, Cout)
    kp["w3m"] = jnp.stack(blocks, axis=0).astype(jnp.bfloat16)             # (4, 4*Cin1p, Cout)
    kp["b3"] = b3.reshape(1, cout).astype(jnp.float32)
    return kp


# ----------------------------------------------------------------------------
# Layer-3 geometry + space-to-depth preparation.
# ----------------------------------------------------------------------------
def _layer3_geometry(ph, pw, cin, *, tm_rows_cap=256):
    hout = (ph - 1) // 2 + 1
    wout = (pw - 1) // 2 + 1
    hpe = (ph + 2) + ((ph + 2) % 2)
    wpe = (pw + 2) + ((pw + 2) % 2)
    hp, wpb = hpe // 2, wpe // 2
    # The wrap-around reads for dw=1 shifts land only in the dropped last block
    # column; this requires wpb == wout + 1 (holds for any ph, pw under the
    # even-padding scheme, asserted here per the correctness review).
    assert wpb == wout + 1, (wpb, wout)
    m_full = hout * wpb
    tm_rows = min(_round_up(m_full, 8), tm_rows_cap)
    m_pad = _round_up(m_full, tm_rows)
    rows_p = _round_up(m_pad + wpb + 1, 8)       # room for the max shifted read
    assert rows_p >= hp * wpb
    cin1 = cin + 1
    cin1p = _round_up(cin1, _CIN_ALIGN)
    return dict(hout=hout, wout=wout, hp=hp, wpb=wpb, m_full=m_full,
                m_pad=m_pad, tm_rows=tm_rows, rows_p=rows_p,
                cin1=cin1, cin1p=cin1p)


def _space_to_depth_pad(tokens, ph, pw, geo):
    """tokens (B, N, Cin) f32 -> ones-augmented, channel/zero-padded, 2x2
    space-to-depth, flattened block grid (B, rows_p, 4*cin1p) bf16."""
    B, N, Cin = tokens.shape
    hp, wpb = geo["hp"], geo["wpb"]
    cin1p, rows_p = geo["cin1p"], geo["rows_p"]
    x = tokens.reshape(B, ph, pw, Cin)
    aug = [x, jnp.ones((B, ph, pw, 1), x.dtype)]
    if cin1p > Cin + 1:
        aug.append(jnp.zeros((B, ph, pw, cin1p - Cin - 1), x.dtype))
    xa = jnp.concatenate(aug, axis=-1)
    xp = jnp.pad(xa, ((0, 0), (1, 2 * hp - ph - 1), (1, 2 * wpb - pw - 1), (0, 0)))
    blk = xp.reshape(B, hp, 2, wpb, 2, cin1p).transpose(0, 1, 3, 2, 4, 5)
    blk = blk.reshape(B, hp * wpb, 4 * cin1p)
    blk = jnp.pad(blk, ((0, 0), (0, rows_p - hp * wpb), (0, 0)))
    # bf16 cast fused into the pad/transpose write (halves the intermediate).
    return blk.astype(jnp.bfloat16)


# ----------------------------------------------------------------------------
# DPTEncoder.forward (use_clstoken=False).
# ----------------------------------------------------------------------------
def dpt_encoder_forward(out_features, patch_h, patch_w, kparams, *, tm=512):
    # TODO(synk): use_clstoken=True branch (readout_projects Linear+GELU) not
    # implemented; the reference module defaults to use_clstoken=False.
    outs = []
    for i, feat in enumerate(out_features):
        x = feat[0]                                  # (B, N, Cin), N = ph*pw, f32
        B, N, Cin = x.shape
        if i in (0, 1):
            wp, bp = kparams[f"wp{i}"], kparams[f"bp{i}"]
            w2, b2 = kparams[f"w2{i}"], kparams[f"b2{i}"]
            k = kparams[f"k{i}"]
            co = wp.shape[1]
            z = fused_proj_resize(x.reshape(B * N, Cin), wp, bp, w2, b2, tm=tm)
            # one lane-dense bf16 kernel store, then a single bf16 pixel-shuffle
            z = z.reshape(B, patch_h, patch_w, co, k, k)
            z = z.transpose(0, 3, 1, 4, 2, 5).reshape(B, co, patch_h * k, patch_w * k)
            outs.append(z)
        elif i == 2:
            wp, bp = kparams["wp2"], kparams["bp2"]
            co = wp.shape[1]
            y = proj_1x1(x.reshape(B * N, Cin), wp, bp, tm=tm)
            outs.append(y.reshape(B, patch_h, patch_w, co).transpose(0, 3, 1, 2))
        else:
            w3m, b3 = kparams["w3m"], kparams["b3"]
            co = w3m.shape[-1]
            geo = _layer3_geometry(patch_h, patch_w, Cin)
            assert 4 * geo["cin1p"] == w3m.shape[1], (geo["cin1p"], w3m.shape)
            xblk = _space_to_depth_pad(x, patch_h, patch_w, geo)
            z = folded_conv3x3s2(xblk, w3m, b3, wp_blocks=geo["wpb"],
                                 tm_rows=geo["tm_rows"], m_pad=geo["m_pad"])
            z = z[:, :geo["m_full"], :].reshape(B, geo["hout"], geo["wpb"], co)
            z = z[:, :, :geo["wout"], :].transpose(0, 3, 1, 2)
            outs.append(z)
    return outs


# ----------------------------------------------------------------------------
# Pure-JAX/XLA semantic reference (NCHW, PyTorch semantics) on the same
# bf16-rounded inputs/weights the kernels consume (outputs kept f32).
# ----------------------------------------------------------------------------
def reference_forward(out_features, ph, pw, proj, resize):
    hi = jax.lax.Precision.HIGHEST
    rd = lambda a: a.astype(jnp.bfloat16).astype(jnp.float32)
    outs = []
    for i, feat in enumerate(out_features):
        x = rd(feat[0])
        B, N, Cin = x.shape
        ximg = x.transpose(0, 2, 1).reshape(B, Cin, ph, pw)
        wp, bp = proj[i]
        y = jax.lax.conv_general_dilated(
            ximg, rd(wp), (1, 1), 'VALID',
            dimension_numbers=('NCHW', 'OIHW', 'NCHW'),
            precision=hi) + bp[None, :, None, None]
        if i in (0, 1):
            wt, bt = resize[i]
            k = wt.shape[-1]
            co = wt.shape[1]
            z = jnp.einsum('bchw,cokl->bohkwl', y, rd(wt), precision=hi)
            z = z.reshape(B, co, ph * k, pw * k) + bt[None, :, None, None]
            outs.append(z)
        elif i == 2:
            outs.append(y)
        else:
            wc, bc = resize[i]
            z = jax.lax.conv_general_dilated(
                y, rd(wc), (2, 2), ((1, 1), (1, 1)),
                dimension_numbers=('NCHW', 'OIHW', 'NCHW'),
                precision=hi) + bc[None, :, None, None]
            outs.append(z)
    return outs


if __name__ == "__main__":
    B = 2
    in_channels = 32
    out_channels = [32, 64, 128, 128]
    patch_h = patch_w = 8
    N = patch_h * patch_w

    key = jax.random.PRNGKey(0)
    kdata, kparam = jax.random.split(key)
    proj, resize = init_params(kparam, in_channels, out_channels)
    kparams = prepare_params(proj, resize)

    # out_features: list of 4 (patch_tokens, cls_token) pairs, as produced by
    # DINOv2's get_intermediate_layers(..., return_class_token=True).
    feat_keys = jax.random.split(kdata, 8)
    out_features = []
    for i in range(4):
        tokens = jax.random.normal(feat_keys[2 * i], (B, N, in_channels), jnp.float32)
        cls_tok = jax.random.normal(feat_keys[2 * i + 1], (B, in_channels), jnp.float32)
        out_features.append((tokens, cls_tok))

    # tm=64 exercises the M-tiled, pipelined grid even at toy token counts
    # (production would use tm=512 on v5e/v6e, 256 on v7x).
    outs = dpt_encoder_forward(out_features, patch_h, patch_w, kparams, tm=64)
    outs = [jax.block_until_ready(o) for o in outs]

    # Shape check against PyTorch semantics.
    expected_shapes = [
        (B, out_channels[0], patch_h * 4, patch_w * 4),
        (B, out_channels[1], patch_h * 2, patch_w * 2),
        (B, out_channels[2], patch_h, patch_w),
        (B, out_channels[3], patch_h // 2, patch_w // 2),
    ]
    for o, s in zip(outs, expected_shapes):
        assert o.shape == s, (o.shape, s)
        assert o.dtype == jnp.bfloat16, o.dtype

    # Numeric check vs the f32 XLA reference (same bf16-rounded params/inputs).
    # Tolerances account for: bf16 output stores (all layers, ~0.4% rel), the
    # fused on-chip bf16 intermediate (layers 0/1) and the bf16 folded weights
    # (layer 3).
    refs = reference_forward(out_features, patch_h, patch_w, proj, resize)
    tols = [(2e-2, 1e-3), (2e-2, 1e-3), (2e-2, 2e-3), (2e-2, 3e-3)]
    for li, (o, r, (rt, at)) in enumerate(zip(outs, refs, tols)):
        of = o.astype(jnp.float32)
        err = float(jnp.max(jnp.abs(of - r)))
        assert jnp.allclose(of, r, rtol=rt, atol=at), (li, err)

    print("KERNEL_OK")
</pallas_src>

<mosaic_0001>
module attributes {stable_mosaic.version = 11 : i64} {
  func.func @_proj_resize_kernel(%arg0: i32, %arg1: memref<64x32xf32, #tpu.memory_space<vmem>>, %arg2: memref<32x32xbf16, #tpu.memory_space<vmem>>, %arg3: memref<1x32xf32, #tpu.memory_space<vmem>>, %arg4: memref<32x512xbf16, #tpu.memory_space<vmem>>, %arg5: memref<1x512xf32, #tpu.memory_space<vmem>>, %arg6: memref<64x512xbf16, #tpu.memory_space<vmem>>) attributes {dimension_semantics = [#tpu.dimension_semantics<parallel>], iteration_bounds = array<i64: 2>, scalar_prefetch = 0 : i64, scratch_operands = 0 : i64, tpu.core_type = #tpu.core_type<tc>, window_params = [{transform_indices = @transform_0, window_bounds = array<i64: 64, 32>}, {pipeline_mode = #tpu.pipeline_mode<synchronous>, transform_indices = @transform_1, window_bounds = array<i64: 32, 32>}, {pipeline_mode = #tpu.pipeline_mode<synchronous>, transform_indices = @transform_2, window_bounds = array<i64: 1, 32>}, {pipeline_mode = #tpu.pipeline_mode<synchronous>, transform_indices = @transform_3, window_bounds = array<i64: 32, 512>}, {pipeline_mode = #tpu.pipeline_mode<synchronous>, transform_indices = @transform_4, window_bounds = array<i64: 1, 512>}, {transform_indices = @transform_5, window_bounds = array<i64: 64, 512>}]} {
    %c0 = arith.constant 0 : index
    %c0_0 = arith.constant 0 : index
    %0 = vector.load %arg1[%c0, %c0_0] : memref<64x32xf32, #tpu.memory_space<vmem>>, vector<64x32xf32>
    %1 = arith.truncf %0 : vector<64x32xf32> to vector<64x32xbf16>
    %c0_1 = arith.constant 0 : index
    %c0_2 = arith.constant 0 : index
    %2 = vector.load %arg2[%c0_1, %c0_2] : memref<32x32xbf16, #tpu.memory_space<vmem>>, vector<32x32xbf16>
    %cst = arith.constant dense<0.000000e+00> : vector<64x32xf32>
    %3 = tpu.matmul %1, %2, %cst {dimension_numbers = #tpu.dot_dimension_numbers<[1], [0], [0], [1], [0, 0, 1, 1], [], []>} : vector<64x32xbf16>, vector<32x32xbf16>, vector<64x32xf32> -> vector<64x32xf32>
    %c0_3 = arith.constant 0 : index
    %c0_4 = arith.constant 0 : index
    %4 = vector.load %arg3[%c0_3, %c0_4] : memref<1x32xf32, #tpu.memory_space<vmem>>, vector<1x32xf32>
    %5 = vector.broadcast %4 : vector<1x32xf32> to vector<64x32xf32>
    %6 = arith.addf %3, %5 : vector<64x32xf32>
    %7 = arith.truncf %6 : vector<64x32xf32> to vector<64x32xbf16>
    %c0_5 = arith.constant 0 : index
    %c0_6 = arith.constant 0 : index
    %8 = vector.load %arg4[%c0_5, %c0_6] : memref<32x512xbf16, #tpu.memory_space<vmem>>, vector<32x512xbf16>
    %cst_7 = arith.constant dense<0.000000e+00> : vector<64x512xf32>
    %9 = tpu.matmul %7, %8, %cst_7 {dimension_numbers = #tpu.dot_dimension_numbers<[1], [0], [0], [1], [0, 0, 1, 1], [], []>} : vector<64x32xbf16>, vector<32x512xbf16>, vector<64x512xf32> -> vector<64x512xf32>
    %c0_8 = arith.constant 0 : index
    %c0_9 = arith.constant 0 : index
    %10 = vector.load %arg5[%c0_8, %c0_9] : memref<1x512xf32, #tpu.memory_space<vmem>>, vector<1x512xf32>
    %11 = vector.broadcast %10 : vector<1x512xf32> to vector<64x512xf32>
    %12 = arith.addf %9, %11 : vector<64x512xf32>
    %13 = arith.truncf %12 : vector<64x512xf32> to vector<64x512xbf16>
    %c0_10 = arith.constant 0 : index
    %c0_11 = arith.constant 0 : index
    %14 = vector.load %arg6[%c0_10, %c0_11] : memref<64x512xbf16, #tpu.memory_space<vmem>>, vector<64x512xbf16>
    tpu.vector_store %arg6[%c0_10, %c0_11], %13 {strides = array<i32>} : memref<64x512xbf16, #tpu.memory_space<vmem>>, vector<64x512xbf16>,
    return
  }
  func.func @transform_0(%arg0: i32) -> (i32, i32) {
    %c0_i32 = arith.constant 0 : i32
    %c0_i32_0 = arith.constant 0 : i32
    return %arg0, %c0_i32 : i32, i32
  }
  func.func @transform_1(%arg0: i32) -> (i32, i32) {
    %c0_i32 = arith.constant 0 : i32
    %c0_i32_0 = arith.constant 0 : i32
    %c0_i32_1 = arith.constant 0 : i32
    return %c0_i32, %c0_i32_0 : i32, i32
  }
  func.func @transform_2(%arg0: i32) -> (i32, i32) {
    %c0_i32 = arith.constant 0 : i32
    %c0_i32_0 = arith.constant 0 : i32
    %c0_i32_1 = arith.constant 0 : i32
    return %c0_i32, %c0_i32_0 : i32, i32
  }
  func.func @transform_3(%arg0: i32) -> (i32, i32) {
    %c0_i32 = arith.constant 0 : i32
    %c0_i32_0 = arith.constant 0 : i32
    %c0_i32_1 = arith.constant 0 : i32
    return %c0_i32, %c0_i32_0 : i32, i32
  }
  func.func @transform_4(%arg0: i32) -> (i32, i32) {
    %c0_i32 = arith.constant 0 : i32
    %c0_i32_0 = arith.constant 0 : i32
    %c0_i32_1 = arith.constant 0 : i32
    return %c0_i32, %c0_i32_0 : i32, i32
  }
  func.func @transform_5(%arg0: i32) -> (i32, i32) {
    %c0_i32 = arith.constant 0 : i32
    %c0_i32_0 = arith.constant 0 : i32
    return %arg0, %c0_i32 : i32, i32
  }
}

</mosaic_0001>

<bundles_post_ra>
// kernel: tpu_custom_call.1
= control target key start
LH: loop header
LB: loop body
LE: loop exit
PB: predicated region body
PF: predicated region fallthrough
CT: control target
= control target key end

     0   :  { %10 = vsyncpa [#allocation3], 0  ;;  %s1220_s0 = inlined_call_operand.vmem [shape: f32[128,32], index: 0, kind: input, shape index: {}]   ;;  %s1221_s1 = inlined_call_operand.vmem [shape: bf16[32,32], index: 1, kind: input, shape index: {}]   ;;  %s1222_s2 = inlined_call_operand.vmem [shape: f32[1,32], index: 2, kind: input, shape index: {}]   ;;  %s1223_s3 = inlined_call_operand.vmem [shape: bf16[32,512], index: 3, kind: input, shape index: {}]   ;;  %s1224_s4 = inlined_call_operand.vmem [shape: f32[1,512], index: 4, kind: input, shape index: {}]   ;;  %s1225_s5 = inlined_call_operand.hbm [shape: bf16[128,512], index: 5, kind: output, shape index: {}]  }
   0x1   :  { %12 = vsyncpa [#allocation3 + $0x1], 0  ;;  %s1007_s18 = smov 0   ;;  %s1009_s19 = smov 0  }
   0x2   :  { %s1011_s20 = smov 0   ;;  %s1013_s21 = smov 0  }
   0x3 LB: > { %s1028_s22 = sadd.s32 4294967295, %s971_s21   ;;  %s761_s23 = sadd.s32 4294967294, %s971_s21   ;;  %s971_s21 = sphi %s1013_s21, %s1231_s21   ;;  %s967_s20 = sphi %s1011_s20, %s1230_s20   ;;  %s963_s19 = sphi %s1009_s19, %s1229_s19   ;;  %s959_s18 = sphi %s1007_s18, %s1228_s18  }
   0x4   : > { %s1032_s24 = sadd.s32 1, %s971_s21   ;;  %s135_s25 = sadd.s32 1, %s967_s20 }
   0x5   : > { %s132_s26 = ssub.s32 %s971_s21, %s1032_s24  ;;  %p145_p0 = scmp.ne.s32.totalorder %s967_s20, %s963_s19 }
   0x6   : > { %p133_p1 = scmp.eq.s32.totalorder %s132_s26, 0  ;;  %p146_p2 = scmp.eq.s32.totalorder %s1028_s22, 1 }
   0x7   : > { %p151_p3 = scmp.ne.s32.totalorder %s963_s19, %s959_s18  ;;  %p152_p4 = scmp.eq.s32.totalorder %s761_s23, 1 }
   0x8   : > { %s1043_s27 = scalar_select %p133_p1, %s967_s20, %s135_s25  }
   0x9   : > { %p1045_p5 = por %p146_p2, %p145_p0  ;;  %p1049_p6 = por %p152_p4, %p151_p3 }
   0xa   : > { %p764_p7 = scmp.ge.s32.totalorder %s971_s21, 1  ;;  %p191_p8 = scmp.lt.s32.totalorder %s971_s21, 3 }
   0xc   : > { %p192_p9 = pnand %p764_p7, %p191_p8 }
   0xd   : > { %v895_v0 = vld [vmem:[%s1221_s1] sm:$0xff] (!%p192_p9)   ;;  %s766_s7 = sshll.u32 (!%p192_p9), %s1028_s22, 3  ;;  %v896_v1 = vld [vmem:[%s1221_s1 + $0x8] sm:$0xff] (!%p192_p9)   ;;  %vm262_vm0 = vcmask (!%p192_p9), 261120   ;;  %v973_v22 = vmov (!%p192_p9), 0   ;;  %v354_v44 = vlaneseq (!%p192_p9)  ;;  %s216_s23 = sand.u32 (!%p192_p9), 1, %s963_s19  }
   0xe   : > { %195 = sbr.rel (%p192_p9) target bundleno = 505 (0x1f9), region = 40  ;;  %p220_p10 = scmp.lt.s32.totalorder (!%p192_p9), %s766_s7, 15  ;;  %837 = vmatprep.subr.bf16.mxu0 (!%p192_p9), %v895_v0  ;;  %849 = vmatprep.subr.bf16.mxu1 (!%p192_p9), %v895_v0  ;;  %v899_v2 = vld [vmem:[%s1223_s3 + $0x4] ss:$16 sps:$4 sm:$0xff] (!%p192_p9)   ;;  %v902_v3 = vld [vmem:[%s1223_s3 + $0xc] ss:$16 sps:$4 sm:$0xff] (!%p192_p9)  }
   0xf   : > { %838 = vmatpush3.bf16.msra.mxu0 (!%p192_p9), %v895_v0  ;;  %851 = vmatpush3.bf16.msra.mxu1 (!%p192_p9), %v895_v0  ;;  %v900_v4 = vld [vmem:[%s1223_s3 + $0x8] ss:$16 sps:$4 sm:$0xff] (!%p192_p9)   ;;  %v897_v16 = vld [vmem:[%s1223_s3] ss:$16 sps:$4 sm:$0xff] (!%p192_p9)   ;;  %v905_v18 = vld [vmem:[%s1223_s3 + $0x24] ss:$16 sps:$4 sm:$0xff] (!%p192_p9)  }
  0x10   : > { %839 = vmatprep.subr.bf16.mxu0 (!%p192_p9), %v896_v1  ;;  %850 = vmatprep.subr.bf16.mxu1 (!%p192_p9), %v896_v1  ;;  %v908_v19 = vld [vmem:[%s1223_s3 + $0x2c] ss:$16 sps:$4 sm:$0xff] (!%p192_p9)   ;;  %v903_v20 = vld [vmem:[%s1223_s3 + $0x20] ss:$16 sps:$4 sm:$0xff] (!%p192_p9)   ;;  %v906_v21 = vld [vmem:[%s1223_s3 + $0x28] ss:$16 sps:$4 sm:$0xff] (!%p192_p9)  }
  0x11   : > { %v768_v24 = vld [vmem:[%s1222_s2] ss:$0 sm:$0xff] (!%p192_p9)  ;;  %v355_v45 = vshrl.u32 (!%p192_p9), %v354_v44, 7  ;;  %s765_s25 = sshll.u32 (!%p192_p9), %s216_s23, 7  ;;  %s830_s30 = sshll.u32 (!%p192_p9), %s1028_s22, 11 }
  0x12   : > { %v352_v48 = vld [vmem:[%s1224_s4] sm:$0xf] (!%p192_p9)  ;;  %s1126_s26 = scalar_lea.vmem (!%p192_p9), [#allocation2], %s765_s25  ;;  %s1169_s22 = scalar_lea.hbm (!%p192_p9), %s1225_s5, %s830_s30 }
  0x13   : > { %840 = vmatpush3.bf16.msra.mxu0 (!%p192_p9), %v896_v1  ;;  %852 = vmatpush3.bf16.msra.mxu1 (!%p192_p9), %v896_v1  ;;  %v356_v46 = vsub.s32 (!%p192_p9), 0, %v355_v45  ;;  %v364_v47 = vsub.s32 (!%p192_p9), 2, %v355_v45  ;;  %v360_v49 = vsub.s32 (!%p192_p9), 1, %v355_v45  ;;  %v368_v50 = vsub.s32 (!%p192_p9), 3, %v355_v45  ;;  %s699_s6 = sshll.u32 (!%p192_p9), %s1126_s26, 4  ;;  %s1179_s9 = scalar_lea.sflag (!%p192_p9), [#allocation3], %s216_s23  ;;  %s1171_s6 = int_to_ptr.vmem [resolvable:$true] %s699_s6 }
  0x14   : > { %426 = vmatprep.subr.bf16.mxu1 (!%p192_p9), %v899_v2  ;;  %499 = vmatprep.subr.bf16.mxu0 (!%p192_p9), %v902_v3  ;;  %s909_s10 = scalar_lea.vmem (!%p192_p9), %s1171_s6, 2048  ;;  %s974_s11 = smov (!%p192_p9), [#allocation2]  }
  0x15   : > { %s1233_s7 = smov (!%p220_p10, %s766_s7), 15  ;;  %v1107_v51 = vrot.slane %v352_v48, %v356_v46  ;;  %v1109_v52 = vrot.slane %v352_v48, %v364_v47  ;;  %v1112_v53 = vrot.slane %v352_v48, %v360_v49  ;;  %v1114_v54 = vrot.slane %v352_v48, %v368_v50  ;;  %p910_p11 = scmp.ne.s32.totalorder %s1171_s6, %s909_s10 }
  0x16   : > { %s767_s14 = sshll.u32 %s1233_s7, 3  ;;  %s913_s12 = sshll.u32 %s974_s11, 4  ;;  %s914_s12 = int_to_ptr.vmem [resolvable:$false] %s913_s12 }
  0x17   : > { %s223_s17 = scalar_lea.vmem %s1220_s0, %s767_s14  ;;  %p911_p12 = pnand %p910_p11, %p1045_p5 }
  0x18   : > { %v227_v5 = vld [vmem:[%s223_s17] sm:$0xff]  ;;  %v228_v6 = vld [vmem:[%s223_s17 + $0x8] sm:$0xff]  ;;  %v229_v7 = vld [vmem:[%s223_s17 + $0x10] sm:$0xff]  ;;  %s915_s13 = scalar_lea.vmem %s914_s12, 4096  ;;  %p916_p0 = scmp.lt.s32.totalorder %s1171_s6, %s914_s12 }
  0x19   : > { %v235_v8 = vpack.c.bf16 %v228_v6, %v227_v5  ;;  %v230_v9 = vld [vmem:[%s223_s17 + $0x18] sm:$0xff]  ;;  %v231_v10 = vld [vmem:[%s223_s17 + $0x20] sm:$0xff]  ;;  %v232_v11 = vld [vmem:[%s223_s17 + $0x28] sm:$0xff]  ;;  %p912_p13 = pneg %p911_p12  ;;  %p917_p1 = scmp.lt.s32.totalorder %s915_s13, %s909_s10 }
  0x1a   : > { %v236_v12 = vpack.c.bf16 %v230_v9, %v229_v7  ;;  %v237_v13 = vpack.c.bf16 %v232_v11, %v231_v10  ;;  %v233_v14 = vld [vmem:[%s223_s17 + $0x30] sm:$0xff]  ;;  %v234_v15 = vld [vmem:[%s223_s17 + $0x38] sm:$0xff] }
  0x1b   : > { %841 = vmatprep.mubr.msk.bf16.mxu0 %vm262_vm0, %v235_v8  ;;  %v238_v17 = vpack.c.bf16 %v234_v15, %v233_v14  ;;  %p918_p2 = por %p917_p1, %p916_p0 }
  0x1c   : > { %842 = vmatmul.mubr.msk.bf16.vlgmr.msra.gmra.mrb[0].mxu0 %vm262_vm0, %v236_v12  ;;  %845 = vmatprep.mubr.msk.bf16.mxu1 %vm262_vm0, %v237_v13 }
  0x1d   : > { %846 = vmatmul.mubr.msk.bf16.vlgmr.msra.gmra.mrb[0].mxu1 %vm262_vm0, %v238_v17  ;;  %500 = vmatpush1.bf16.msra.mxu0 %v900_v4  ;;  %p919_p3 = pnand %p918_p2, %p912_p13 }
  0x1e   : > { %427 = vmatpush1.bf16.msra.mxu1 %v897_v16  ;;  %501 = vmatprep.subr.bf16.mxu0 %v908_v19 }
  0x1f   : > { %428 = vmatprep.subr.bf16.mxu1 %v905_v18  ;;  %458 = vmatprep.mubr.bf16.mxu1 %v973_v22 }
  0x20   : > { %531 = vmatprep.mubr.bf16.mxu0 %v973_v22 }
  0x21   : > { %502 = vmatpush1.bf16.msra.mxu0 %v906_v21 }
  0x22   : > { %429 = vmatpush1.bf16.msra.mxu1 %v903_v20 }
  0xef   : > { %v843_v23 = vpop.f32.mrb[0].mxu0 }
  0xf0   : > { %v309_v25 = vpop.f32.mrb[1].mxu0  ;;  %v847_v26 = vpop.f32.mrb[0].mxu1  ;;  %v318_v30 = vadd.f32 %v843_v23, %v768_v24 }
  0xf1   : > { %v844_v27 = vpop.f32.mrb[2].mxu0  ;;  %v334_v28 = vadd.f32 %v847_v26, %v768_v24  ;;  %v325_v29 = vpop.f32.mrb[1].mxu1  ;;  %v310_v35 = vadd.f32 %v768_v24, %v309_v25 }
  0xf2   : > { %v321_v31 = vadd.f32 %v844_v27, %v768_v24  ;;  %v312_v32 = vpop.f32.mrb[3].mxu0  ;;  %v326_v33 = vadd.f32 %v768_v24, %v325_v29  ;;  %v848_v34 = vpop.f32.mrb[2].mxu1 }
  0xf3   : > { %v313_v36 = vadd.f32 %v768_v24, %v312_v32  ;;  %v337_v37 = vadd.f32 %v848_v34, %v768_v24  ;;  %v328_v38 = vpop.f32.mrb[3].mxu1 }
  0xf4   : > { %v341_v39 = vpack.c.bf16 %v321_v31, %v318_v30  ;;  %v329_v40 = vadd.f32 %v768_v24, %v328_v38 }
  0xf5   : > { %v340_v41 = vpack.c.bf16 %v313_v36, %v310_v35  ;;  %v343_v42 = vpack.c.bf16 %v337_v37, %v334_v28 }
  0xf6   : > { %v342_v43 = vpack.c.bf16 %v329_v40, %v326_v33 }
  0xf7   : > { %783 = vmatmul.mubr.msk.bf16.vlgmr.msra.gmra.mrb[4].mxu1 %vm262_vm0, %v340_v41  ;;  %787 = vmatmul.mubr.msk.bf16.vlgmr.msra.gmra.mrb[4].mxu0 %vm262_vm0, %v340_v41 }
  0xf8   : > { %468 = vmatprep.mubr.bf16.mxu1 %v973_v22  ;;  %541 = vmatprep.mubr.bf16.mxu0 %v973_v22 }
  0xff   : > { %784 = vmatmul.mubr.msk.bf16.gmra.mrb[8].mxu1 %vm262_vm0, %v341_v39  ;;  %788 = vmatmul.mubr.msk.bf16.gmra.mrb[8].mxu0 %vm262_vm0, %v341_v39 }
 0x100   : > { %478 = vmatprep.mubr.bf16.mxu1 %v973_v22  ;;  %551 = vmatprep.mubr.bf16.mxu0 %v973_v22 }
 0x107   : > { %785 = vmatmul.mubr.msk.bf16.gmra.mrb[12].mxu1 %vm262_vm0, %v342_v43  ;;  %789 = vmatmul.mubr.msk.bf16.gmra.mrb[12].mxu0 %vm262_vm0, %v342_v43 }
 0x108   : > { %488 = vmatprep.mubr.bf16.mxu1 %v973_v22  ;;  %561 = vmatprep.mubr.bf16.mxu0 %v973_v22 }
 0x10f   : > { %786 = vmatmul.mubr.msk.bf16.gmra.mrb[16].mxu1 %vm262_vm0, %v343_v42  ;;  %790 = vmatmul.mubr.msk.bf16.gmra.mrb[16].mxu0 %vm262_vm0, %v343_v42 }
 0x1ca   : > { %v460_v55 = vpop.f32.mrb[4].mxu1  ;;  %v533_v56 = vpop.f32.mrb[4].mxu0 }
 0x1cb   : > { %v461_v57 = vadd.f32 %v460_v55, %v1107_v51  ;;  %v534_v58 = vadd.f32 %v533_v56, %v1109_v52  ;;  %v462_v59 = vpop.f32.mrb[5].mxu1  ;;  %v535_v60 = vpop.f32.mrb[5].mxu0 }
 0x1cc   : > { %v463_v61 = vadd.f32 %v462_v59, %v1112_v53  ;;  %v536_v62 = vadd.f32 %v535_v60, %v1114_v54  ;;  %v464_v63 = vpop.f32.mrb[6].mxu1  ;;  %v537_v0 = vpop.f32.mrb[6].mxu0 }
 0x1cd   : > { %v465_v1 = vadd.f32 %v464_v63, %v1107_v51  ;;  %v538_v2 = vadd.f32 %v537_v0, %v1109_v52  ;;  %v466_v3 = vpop.f32.mrb[7].mxu1  ;;  %v539_v4 = vpop.f32.mrb[7].mxu0 }
 0x1ce   : > { %v813_v5 = vpack.c.bf16 %v463_v61, %v461_v57  ;;  %v814_v6 = vpack.c.bf16 %v536_v62, %v534_v58  ;;  %v467_v7 = vadd.f32 %v466_v3, %v1112_v53  ;;  %v540_v8 = vadd.f32 %v539_v4, %v1114_v54 }
 0x1d0   : > { %668 = vst [vmem:[%s1126_s26] sm:$0xff] %v813_v5  ;;  %669 = vst [vmem:[%s1126_s26 + $0x8] sm:$0xff] %v814_v6  ;;  %v815_v9 = vpack.c.bf16 %v467_v7, %v465_v1  ;;  %v816_v10 = vpack.c.bf16 %v540_v8, %v538_v2 }
 0x1d2   : > { %670 = vst [vmem:[%s1126_s26 + $0x10] sm:$0xff] %v815_v9  ;;  %671 = vst [vmem:[%s1126_s26 + $0x18] sm:$0xff] %v816_v10  ;;  %v470_v11 = vpop.f32.mrb[8].mxu1  ;;  %v543_v12 = vpop.f32.mrb[8].mxu0 }
 0x1d3   : > { %v471_v13 = vadd.f32 %v470_v11, %v1107_v51  ;;  %v544_v14 = vadd.f32 %v543_v12, %v1109_v52  ;;  %v472_v15 = vpop.f32.mrb[9].mxu1  ;;  %v545_v16 = vpop.f32.mrb[9].mxu0 }
 0x1d4   : > { %v473_v17 = vadd.f32 %v472_v15, %v1112_v53  ;;  %v546_v18 = vadd.f32 %v545_v16, %v1114_v54  ;;  %v474_v19 = vpop.f32.mrb[10].mxu1  ;;  %v547_v20 = vpop.f32.mrb[10].mxu0 }
 0x1d5   : > { %v475_v21 = vadd.f32 %v474_v19, %v1107_v51  ;;  %v548_v22 = vadd.f32 %v547_v20, %v1109_v52  ;;  %v476_v23 = vpop.f32.mrb[11].mxu1  ;;  %v549_v24 = vpop.f32.mrb[11].mxu0 }
 0x1d6   : > { %v817_v25 = vpack.c.bf16 %v473_v17, %v471_v13  ;;  %v818_v26 = vpack.c.bf16 %v546_v18, %v544_v14  ;;  %v477_v27 = vadd.f32 %v476_v23, %v1112_v53  ;;  %v550_v28 = vadd.f32 %v549_v24, %v1114_v54 }
 0x1d8   : > { %672 = vst [vmem:[%s1126_s26 + $0x20] sm:$0xff] %v817_v25  ;;  %673 = vst [vmem:[%s1126_s26 + $0x28] sm:$0xff] %v818_v26  ;;  %v819_v29 = vpack.c.bf16 %v477_v27, %v475_v21  ;;  %v820_v30 = vpack.c.bf16 %v550_v28, %v548_v22 }
 0x1da   : > { %674 = vst [vmem:[%s1126_s26 + $0x30] sm:$0xff] %v819_v29  ;;  %675 = vst [vmem:[%s1126_s26 + $0x38] sm:$0xff] %v820_v30  ;;  %v480_v31 = vpop.f32.mrb[12].mxu1  ;;  %v553_v32 = vpop.f32.mrb[12].mxu0 }
 0x1db   : > { %v481_v33 = vadd.f32 %v480_v31, %v1107_v51  ;;  %v554_v34 = vadd.f32 %v553_v32, %v1109_v52  ;;  %v482_v35 = vpop.f32.mrb[13].mxu1  ;;  %v555_v36 = vpop.f32.mrb[13].mxu0 }
 0x1dc   : > { %v483_v37 = vadd.f32 %v482_v35, %v1112_v53  ;;  %v556_v38 = vadd.f32 %v555_v36, %v1114_v54  ;;  %v484_v39 = vpop.f32.mrb[14].mxu1  ;;  %v557_v40 = vpop.f32.mrb[14].mxu0 }
 0x1dd   : > { %v485_v41 = vadd.f32 %v484_v39, %v1107_v51  ;;  %v558_v42 = vadd.f32 %v557_v40, %v1109_v52  ;;  %v486_v43 = vpop.f32.mrb[15].mxu1  ;;  %v559_v44 = vpop.f32.mrb[15].mxu0 }
 0x1de   : > { %v821_v45 = vpack.c.bf16 %v483_v37, %v481_v33  ;;  %v822_v46 = vpack.c.bf16 %v556_v38, %v554_v34  ;;  %v487_v47 = vadd.f32 %v486_v43, %v1112_v53  ;;  %v560_v48 = vadd.f32 %v559_v44, %v1114_v54 }
 0x1e0   : > { %676 = vst [vmem:[%s1126_s26 + $0x40] sm:$0xff] %v821_v45  ;;  %677 = vst [vmem:[%s1126_s26 + $0x48] sm:$0xff] %v822_v46  ;;  %v823_v49 = vpack.c.bf16 %v487_v47, %v485_v41  ;;  %v824_v50 = vpack.c.bf16 %v560_v48, %v558_v42 }
 0x1e2   : > { %678 = vst [vmem:[%s1126_s26 + $0x50] sm:$0xff] %v823_v49  ;;  %679 = vst [vmem:[%s1126_s26 + $0x58] sm:$0xff] %v824_v50  ;;  %v490_v55 = vpop.f32.mrb[16].mxu1  ;;  %v563_v56 = vpop.f32.mrb[16].mxu0 }
 0x1e3   : > { %v491_v57 = vadd.f32 %v490_v55, %v1107_v51  ;;  %v564_v58 = vadd.f32 %v563_v56, %v1109_v52  ;;  %v492_v59 = vpop.f32.mrb[17].mxu1  ;;  %v565_v60 = vpop.f32.mrb[17].mxu0 }
 0x1e4   : > { %v493_v61 = vadd.f32 %v492_v59, %v1112_v53  ;;  %v566_v62 = vadd.f32 %v565_v60, %v1114_v54  ;;  %v494_v63 = vpop.f32.mrb[18].mxu1  ;;  %v567_v0 = vpop.f32.mrb[18].mxu0 }
 0x1e5   : > { %v495_v1 = vadd.f32 %v494_v63, %v1107_v51  ;;  %v568_v2 = vadd.f32 %v567_v0, %v1109_v52  ;;  %v496_v3 = vpop.f32.mrb[19].mxu1  ;;  %v569_v4 = vpop.f32.mrb[19].mxu0 }
 0x1e6   : > { %v825_v5 = vpack.c.bf16 %v493_v61, %v491_v57  ;;  %v826_v6 = vpack.c.bf16 %v566_v62, %v564_v58  ;;  %v497_v7 = vadd.f32 %v496_v3, %v1112_v53  ;;  %v570_v8 = vadd.f32 %v569_v4, %v1114_v54 }
 0x1e8   : > { %680 = vst [vmem:[%s1126_s26 + $0x60] sm:$0xff] %v825_v5  ;;  %681 = vst [vmem:[%s1126_s26 + $0x68] sm:$0xff] %v826_v6  ;;  %v827_v51 = vpack.c.bf16 %v497_v7, %v495_v1  ;;  %v828_v52 = vpack.c.bf16 %v570_v8, %v568_v2 }
 0x1ea   : > { %682 = vst [vmem:[%s1126_s26 + $0x70] sm:$0xff] %v827_v51  ;;  %683 = vst [vmem:[%s1126_s26 + $0x78] sm:$0xff] %v828_v52 }
 0x1eb   : > { %922 = shalt.err (!%p919_p3)
}
 0x1ec   : > { %s923_s14 = scalar_lea.hbm %s1169_s22, 2048  ;;  %s927_s17 = scalar_lea.hbm %s1225_s5, 4096 }
 0x1ed   : > { %p924_p4 = scmp.ne.s32.totalorder %s1169_s22, %s923_s14  ;;  %p928_p9 = scmp.lt.u32.totalorder %s1169_s22, %s1225_s5 }
 0x1ee   : > { %p929_p10 = scmp.lt.u32.totalorder %s927_s17, %s923_s14  ;;  %p931_p12 = scmp.lt.u32.totalorder %s923_s14, %s1169_s22 }
 0x1ef   : > { %p925_p7 = pnand %p924_p4, %p1045_p5 }
 0x1f0   : > { %p930_p11 = por %p929_p10, %p928_p9 }
 0x1f1   : > { %p926_p8 = pneg %p925_p7 }
 0x1f2   : > { %p932_p13 = por %p931_p12, %p930_p11 }
 0x1f4   : > { %p933_p0 = pnand %p932_p13, %p926_p8 }
 0x1f6   : > { %936 = shalt.err (!%p933_p0)
}
 0x1f7   : > { %s975_s26 = smov 256   ;;  %s976_s30 = smov 16  }
 0x1f8   : > { %853 = dma.vmem_to_hbm [thread:$0]  (%p1045_p5), %s1171_s6, 2048, %s1169_s22, %s1179_s9, %s975_s26, %s975_s26, %s976_s30  }
 0x1f9 PF: > { %p859_p1 = scmp.ge.s32.totalorder %s971_s21, 2  ;;  %s714_s7 = sand.u32 1, %s959_s18  }
 0x1fa   : > { %s715_s8 = scalar_lea.sflag [#allocation3], %s714_s7 }
 0x1fb   : > { %p856_p2 = pnand %p859_p1, %p1049_p6 }
 0x1fd   : > { %954 = dma.done.wait (!%p856_p2), %s715_s8, 2048  }
 0x1fe   : > { %956 = vsyncadd (!%p856_p2), %s715_s8, 4294965248  ;;  %p15_p3 = scmp.ge.s32.totalorder %s1032_s24, 4   ;;  %s1228_s18 = smov %s963_s19 }
 0x1ff   : > { %s1229_s19 = smov %s967_s20  ;;  %s1230_s20 = smov %s1043_s27 }
 0x200   : > { %s1231_s21 = smov %s1032_s24  ;;  %17 = sbr.rel (!%p15_p3) target bundleno = 3 (0x3), region = 75 }
 0x207   :  { %720 = vsyncpa [#allocation3], 1 }
 0x208   :  { %722 = vsyncpa [#allocation3 + $0x1], 1 }

</bundles_post_ra>
